<compile_context>
chip_gen: v5e
topology: v5e:2x2
jax: 0.10.0
libtpu: 0.0.40
codegen_flags: <defaults>
</compile_context>

<pallas_src>
import functools

import jax
import jax.numpy as jnp
from jax.experimental import pallas as pl
from jax.experimental.pallas import tpu as pltpu


def _round_up(x, m):
    return ((x + m - 1) // m) * m


def _largest_divisor(n, cap, multiple):
    """Largest divisor of n that is <= cap and a multiple of `multiple`."""
    best = None
    c = multiple
    limit = min(cap, n)
    while c <= limit:
        if n % c == 0:
            best = c
        c += multiple
    return best if best is not None else n


def _vmem_budget_bytes():
    """~3/4 of physical VMEM: ~48 MiB on v7x (64 MiB/TC), ~96 MiB on v5e/v6e."""
    phys = 64 * 1024 * 1024
    try:
        info = pltpu.get_tpu_info()
        phys = int(getattr(info, "vmem_capacity_bytes", phys) or phys)
    except Exception:
        pass
    return (phys * 3) // 4


def _proto_sed_kernel(h_ref, pmean_ref, pb2_ref, out_ref, acc_ref, *,
                      inv_t, chunk):
    """Streaming mean-pool over time + negative squared euclidean distance.

    h_ref:     (bB, bT, D)     encoder hidden-state tile (f32 or bf16)
    pmean_ref: (L, D)          per-label mean prototype (f32)
    pb2_ref:   (1, L)          per-label mean squared prototype norm (f32)
    out_ref:   (1, bB, L)      logits tile (f32)
    acc_ref:   (bB, D)         f32 scratch, running time-sum
    """
    t = pl.program_id(1)

    @pl.when(t == 0)
    def _():
        acc_ref[...] = jnp.zeros_like(acc_ref)

    block_t = h_ref.shape[1]
    n_chunks = block_t // chunk

    # Per-step work: accumulate the time-sum in f32, chunked so the cast
    # temporary stays <= (bB, chunk, D) instead of the full tile.
    if n_chunks == 1:
        acc_ref[...] += jnp.sum(h_ref[...].astype(jnp.float32), axis=1)
    else:
        def body(c, carry):
            start = pl.multiple_of(c * chunk, chunk)
            sl = h_ref[:, pl.ds(start, chunk), :].astype(jnp.float32)
            acc_ref[...] += jnp.sum(sl, axis=1)
            return carry

        jax.lax.fori_loop(0, n_chunks, body, 0, unroll=True)

    # Finalize only on the last time step.
    @pl.when(t == pl.num_programs(1) - 1)
    def _():
        pooled = acc_ref[...] * inv_t                              # (bB, D)
        a2 = jnp.sum(pooled * pooled, axis=-1, keepdims=True)      # (bB, 1)
        # (bB, D) x (L, D) contracted on D -> (bB, L); no explicit transpose.
        ab = jax.lax.dot_general(
            pooled, pmean_ref[...],
            dimension_numbers=(((1,), (1,)), ((), ())),
            preferred_element_type=jnp.float32)
        out_ref[0] = (2.0 * ab - a2 - pb2_ref[...]).astype(out_ref.dtype)


def prototype_logits(hidden_states, prototypes, *, num_prototypes, num_labels,
                     block_b=None, block_t=None):
    """(B,T,D) hidden states + (L*P, D) prototypes -> (B, L) logits."""
    B, T, D = hidden_states.shape
    M, D2 = prototypes.shape
    assert D == D2 and M == num_prototypes * num_labels

    # --- one-time prototype pre-reduction (weights; exact algebra) ----------
    # PyTorch: logits.reshape(-1, P, L).mean(1), i.e. prototype row m = p*L + l.
    p32 = prototypes.astype(jnp.float32)
    p_lab = p32.reshape(num_prototypes, num_labels, D)
    p_mean = jnp.mean(p_lab, axis=0)                                  # (L, D)
    p_b2 = jnp.mean(jnp.sum(p_lab * p_lab, axis=-1), axis=0)          # (L,)
    p_b2 = p_b2.reshape(1, num_labels)

    in_itemsize = jnp.dtype(hidden_states.dtype).itemsize
    sub = {4: 8, 2: 16, 1: 32}.get(in_itemsize, 8)   # sublane packing factor
    budget = _vmem_budget_bytes()

    # --- batch tile: <= 8, and batch grid >= 2 whenever B >= 2 (megacore) ---
    if block_b is None:
        block_b = min(8, max(1, B // 2))
    B_pad = _round_up(B, block_b)

    # --- time tile: double-buffered input tile <= ~half the VMEM budget -----
    if block_t is None:
        max_bt = (budget // 2) // (2 * block_b * D * in_itemsize)
        max_bt = max(sub, (max_bt // sub) * sub)
        cap = min(1024, max_bt)
        t_sub = _round_up(T, sub)
        if t_sub <= min(128, cap):
            block_t = t_sub
        else:
            block_t = max(128, min((cap // 128) * 128, _round_up(T, 128)))
    else:
        block_t = _round_up(block_t, sub)
    T_pad = _round_up(T, block_t)

    # Chunked f32 accumulation: cast temporary bounded to <= 128 time rows.
    chunk = _largest_divisor(block_t, 128, sub)

    grid_b = B_pad // block_b
    grid_t = T_pad // block_t
    grid = (grid_b, grid_t)

    # Zero-padding does not change the time-sum; inv_t keeps the original T.
    if (B_pad, T_pad) != (B, T):
        hidden_states = jnp.pad(
            hidden_states, ((0, B_pad - B), (0, T_pad - T), (0, 0)))

    vmem_need = (2 * block_b * block_t * D * in_itemsize       # dbl-buf input
                 + 2 * block_b * chunk * D * 4                 # cast/sum temps
                 + block_b * D * 4                             # accumulator
                 + 2 * block_b * num_labels * 4                # output
                 + 2 * (num_labels * D * 4 + num_labels * 4))  # prototypes
    vmem_limit = int(min(budget, max(32 * 1024 * 1024, 2 * vmem_need)))

    cost = pl.CostEstimate(
        flops=B_pad * T_pad * D + 2 * B_pad * D * num_labels + 3 * B_pad * D,
        transcendentals=0,
        bytes_accessed=(B_pad * T_pad * D * in_itemsize
                        + num_labels * D * 4 + num_labels * 4
                        + B_pad * num_labels * 4),
    )

    kernel = functools.partial(_proto_sed_kernel, inv_t=1.0 / T, chunk=chunk)

    out = pl.pallas_call(
        kernel,
        out_shape=jax.ShapeDtypeStruct((grid_b, block_b, num_labels),
                                       jnp.float32),
        grid_spec=pltpu.PrefetchScalarGridSpec(
            num_scalar_prefetch=0,
            grid=grid,
            in_specs=[
                pl.BlockSpec((block_b, block_t, D), lambda b, t: (b, t, 0)),
                pl.BlockSpec((num_labels, D), lambda b, t: (0, 0)),
                pl.BlockSpec((1, num_labels), lambda b, t: (0, 0)),
            ],
            out_specs=pl.BlockSpec((1, block_b, num_labels),
                                   lambda b, t: (b, 0, 0)),
            scratch_shapes=[pltpu.VMEM((block_b, D), jnp.float32)],
        ),
        compiler_params=pltpu.CompilerParams(
            dimension_semantics=("parallel", "arbitrary"),
            vmem_limit_bytes=vmem_limit,
        ),
        cost_estimate=cost,
    )(hidden_states, p_mean, p_b2)

    return out.reshape(B_pad, num_labels)[:B]


def reference_logits(hidden_states, prototypes, *, num_prototypes, num_labels):
    """Pure-JAX reference mirroring AutoGraderPrototypeModel.negative_sed."""
    pooled = jnp.mean(hidden_states.astype(jnp.float32), axis=1)       # (B, D)
    a = pooled[:, None, :]                                             # (B, 1, D)
    b = prototypes.astype(jnp.float32)[None, :, :]                     # (1, M, D)
    logits = -jnp.sum((a - b) ** 2, axis=2)                            # (B, M)
    logits = logits.reshape(-1, num_prototypes, num_labels)            # (B, P, L)
    return jnp.mean(logits, axis=1)                                    # (B, L)


if __name__ == "__main__":
    num_labels = 4
    num_prototypes = 3
    M = num_labels * num_prototypes

    keys = jax.random.split(jax.random.PRNGKey(0), 8)

    # --- test 1: tiny f32 shapes, default tiling (batch grid = 2) -----------
    B, T, D = 2, 16, 32
    h = jax.random.normal(keys[0], (B, T, D), dtype=jnp.float32)
    protos = 0.1 * jax.random.normal(keys[1], (M, D), dtype=jnp.float32)
    out = jax.block_until_ready(prototype_logits(
        h, protos, num_prototypes=num_prototypes, num_labels=num_labels))
    ref = reference_logits(h, protos, num_prototypes=num_prototypes,
                           num_labels=num_labels)
    assert out.shape == (B, num_labels)
    assert jnp.allclose(out, ref, atol=1e-4, rtol=1e-4), (out, ref)

    # --- test 2: bf16 input, odd T (exercises T padding + bf16 tiling) ------
    B, T, D = 6, 50, 128
    h = jax.random.normal(keys[2], (B, T, D), dtype=jnp.float32
                          ).astype(jnp.bfloat16)
    protos = 0.1 * jax.random.normal(keys[3], (M, D), dtype=jnp.float32)
    out = jax.block_until_ready(prototype_logits(
        h, protos, num_prototypes=num_prototypes, num_labels=num_labels))
    ref = reference_logits(h, protos, num_prototypes=num_prototypes,
                           num_labels=num_labels)
    assert out.shape == (B, num_labels)
    assert jnp.allclose(out, ref, atol=5e-3, rtol=5e-3), (out, ref)

    # --- test 3: longer T, default tiling (chunked f32 accumulation) --------
    B, T, D = 4, 256, 128
    h = jax.random.normal(keys[4], (B, T, D), dtype=jnp.float32)
    protos = 0.1 * jax.random.normal(keys[5], (M, D), dtype=jnp.float32)
    out = jax.block_until_ready(prototype_logits(
        h, protos, num_prototypes=num_prototypes, num_labels=num_labels))
    ref = reference_logits(h, protos, num_prototypes=num_prototypes,
                           num_labels=num_labels)
    assert out.shape == (B, num_labels)
    assert jnp.allclose(out, ref, atol=1e-4, rtol=1e-4), (out, ref)

    # --- test 4: explicit tiles -> multi-step (batch, time) grid ------------
    out = jax.block_until_ready(prototype_logits(
        h, protos, num_prototypes=num_prototypes, num_labels=num_labels,
        block_b=2, block_t=64))
    assert out.shape == (B, num_labels)
    assert jnp.allclose(out, ref, atol=1e-4, rtol=1e-4), (out, ref)

    print("KERNEL_OK")
</pallas_src>

<mosaic_0001>
module attributes {stable_mosaic.version = 11 : i64} {
  func.func @_proto_sed_kernel(%arg0: i32, %arg1: i32, %arg2: memref<1x16x32xf32, #tpu.memory_space<vmem>>, %arg3: memref<4x32xf32, #tpu.memory_space<vmem>>, %arg4: memref<1x4xf32, #tpu.memory_space<vmem>>, %arg5: memref<1x1x4xf32, #tpu.memory_space<vmem>>, %arg6: memref<1x32xf32, #tpu.memory_space<vmem>>) attributes {dimension_semantics = [#tpu.dimension_semantics<parallel>, #tpu.dimension_semantics<arbitrary>], iteration_bounds = array<i64: 2, 1>, scalar_prefetch = 0 : i64, scratch_operands = 1 : i64, tpu.core_type = #tpu.core_type<tc>, window_params = [{transform_indices = @transform_0, window_bounds = array<i64: 1, 16, 32>}, {pipeline_mode = #tpu.pipeline_mode<synchronous>, transform_indices = @transform_1, window_bounds = array<i64: 4, 32>}, {pipeline_mode = #tpu.pipeline_mode<synchronous>, transform_indices = @transform_2, window_bounds = array<i64: 1, 4>}, {transform_indices = @transform_3, window_bounds = array<i64: 1, 1, 4>}]} {
    %c0_i32 = arith.constant 0 : i32
    %0 = arith.cmpi eq, %arg1, %c0_i32 : i32
    %1 = arith.extui %0 : i1 to i32
    %c0_i32_0 = arith.constant 0 : i32
    %2 = arith.cmpi ne, %1, %c0_i32_0 : i32
    scf.if %2 {
      %cst_9 = arith.constant 0.000000e+00 : f32
      %11 = vector.broadcast %cst_9 : f32 to vector<1x32xf32>
      %c0_10 = arith.constant 0 : index
      %c0_11 = arith.constant 0 : index
      %12 = vector.load %arg6[%c0_10, %c0_11] : memref<1x32xf32, #tpu.memory_space<vmem>>, vector<1x32xf32>
      tpu.vector_store %arg6[%c0_10, %c0_11], %11 {strides = array<i32>} : memref<1x32xf32, #tpu.memory_space<vmem>>, vector<1x32xf32>,
    } else {
    }
    %c0 = arith.constant 0 : index
    %c0_1 = arith.constant 0 : index
    %3 = vector.load %arg6[%c0, %c0_1] : memref<1x32xf32, #tpu.memory_space<vmem>>, vector<1x32xf32>
    %c0_2 = arith.constant 0 : index
    %c0_3 = arith.constant 0 : index
    %c0_4 = arith.constant 0 : index
    %4 = vector.load %arg2[%c0_2, %c0_3, %c0_4] : memref<1x16x32xf32, #tpu.memory_space<vmem>>, vector<1x16x32xf32>
    %cst = arith.constant dense<0.000000e+00> : vector<1x32xf32>
    %5 = vector.multi_reduction <add>, %4, %cst [1] : vector<1x16x32xf32> to vector<1x32xf32>
    %6 = arith.addf %3, %5 : vector<1x32xf32>
    %c0_5 = arith.constant 0 : index
    %c0_6 = arith.constant 0 : index
    %7 = vector.load %arg6[%c0_5, %c0_6] : memref<1x32xf32, #tpu.memory_space<vmem>>, vector<1x32xf32>
    tpu.vector_store %arg6[%c0_5, %c0_6], %6 {strides = array<i32>} : memref<1x32xf32, #tpu.memory_space<vmem>>, vector<1x32xf32>,
    %c0_i32_7 = arith.constant 0 : i32
    %8 = arith.cmpi eq, %arg1, %c0_i32_7 : i32
    %9 = arith.extui %8 : i1 to i32
    %c0_i32_8 = arith.constant 0 : i32
    %10 = arith.cmpi ne, %9, %c0_i32_8 : i32
    scf.if %10 {
      %c0_9 = arith.constant 0 : index
      %c0_10 = arith.constant 0 : index
      %11 = vector.load %arg6[%c0_9, %c0_10] : memref<1x32xf32, #tpu.memory_space<vmem>>, vector<1x32xf32>
      %cst_11 = arith.constant 6.250000e-02 : f32
      %12 = vector.broadcast %cst_11 : f32 to vector<1x32xf32>
      %13 = arith.mulf %11, %12 : vector<1x32xf32>
      %14 = arith.mulf %13, %13 : vector<1x32xf32>
      %cst_12 = arith.constant dense<0.000000e+00> : vector<1xf32>
      %15 = vector.multi_reduction <add>, %14, %cst_12 [1] : vector<1x32xf32> to vector<1xf32>
      %16 = vector.shape_cast %15 : vector<1xf32> to vector<1x1xf32>
      %c0_13 = arith.constant 0 : index
      %c0_14 = arith.constant 0 : index
      %17 = vector.load %arg3[%c0_13, %c0_14] : memref<4x32xf32, #tpu.memory_space<vmem>>, vector<4x32xf32>
      %cst_15 = arith.constant dense<0.000000e+00> : vector<1x4xf32>
      %18 = tpu.matmul %13, %17, %cst_15 {dimension_numbers = #tpu.dot_dimension_numbers<[1], [1], [0], [0], [0, 0, 1, 0], [], []>} : vector<1x32xf32>, vector<4x32xf32>, vector<1x4xf32> -> vector<1x4xf32>
      %cst_16 = arith.constant 2.000000e+00 : f32
      %19 = vector.broadcast %cst_16 : f32 to vector<1x4xf32>
      %20 = arith.mulf %19, %18 : vector<1x4xf32>
      %21 = vector.broadcast %16 : vector<1x1xf32> to vector<1x4xf32>
      %22 = arith.subf %20, %21 : vector<1x4xf32>
      %c0_17 = arith.constant 0 : index
      %c0_18 = arith.constant 0 : index
      %23 = vector.load %arg4[%c0_17, %c0_18] : memref<1x4xf32, #tpu.memory_space<vmem>>, vector<1x4xf32>
      %24 = arith.subf %22, %23 : vector<1x4xf32>
      %c0_19 = arith.constant 0 : index
      %c0_20 = arith.constant 0 : index
      %c0_21 = arith.constant 0 : index
      %25 = vector.load %arg5[%c0_19, %c0_20, %c0_21] : memref<1x1x4xf32, #tpu.memory_space<vmem>>, vector<1x1x4xf32>
      %26 = vector.shape_cast %25 : vector<1x1x4xf32> to vector<1x4xf32>
      %27 = vector.shape_cast %24 : vector<1x4xf32> to vector<1x1x4xf32>
      tpu.vector_store %arg5[%c0_19, %c0_20, %c0_21], %27 {strides = array<i32>} : memref<1x1x4xf32, #tpu.memory_space<vmem>>, vector<1x1x4xf32>,
    } else {
    }
    return
  }
  func.func @transform_0(%arg0: i32, %arg1: i32) -> (i32, i32, i32) {
    %c0_i32 = arith.constant 0 : i32
    %c0_i32_0 = arith.constant 0 : i32
    return %arg0, %arg1, %c0_i32 : i32, i32, i32
  }
  func.func @transform_1(%arg0: i32, %arg1: i32) -> (i32, i32) {
    %c0_i32 = arith.constant 0 : i32
    %c0_i32_0 = arith.constant 0 : i32
    %c0_i32_1 = arith.constant 0 : i32
    return %c0_i32, %c0_i32_0 : i32, i32
  }
  func.func @transform_2(%arg0: i32, %arg1: i32) -> (i32, i32) {
    %c0_i32 = arith.constant 0 : i32
    %c0_i32_0 = arith.constant 0 : i32
    %c0_i32_1 = arith.constant 0 : i32
    return %c0_i32, %c0_i32_0 : i32, i32
  }
  func.func @transform_3(%arg0: i32, %arg1: i32) -> (i32, i32, i32) {
    %c0_i32 = arith.constant 0 : i32
    %c0_i32_0 = arith.constant 0 : i32
    %c0_i32_1 = arith.constant 0 : i32
    return %arg0, %c0_i32, %c0_i32_0 : i32, i32, i32
  }
}

</mosaic_0001>

<bundles_post_ra>
// kernel: tpu_custom_call.1
= control target key start
LH: loop header
LB: loop body
LE: loop exit
PB: predicated region body
PF: predicated region fallthrough
CT: control target
= control target key end

     0   :  { %s812_s0 = inlined_call_operand.hbm [shape: f32[2,16,32], index: 0, kind: input, shape index: {}]   ;;  %s813_s1 = inlined_call_operand.hbm [shape: f32[4,32], index: 1, kind: input, shape index: {}]   ;;  %s814_s2 = inlined_call_operand.vmem [shape: f32[1,4], index: 2, kind: input, shape index: {}]   ;;  %s815_s3 = inlined_call_operand.hbm [shape: f32[2,1,4], index: 3, kind: output, shape index: {}]  }
   0x1   :  { %816 = sst [smem:[#allocation12_spill]] %s813_s1 }
   0x2   :  { %8 = vsyncpa [#allocation4], 0 }
   0x3   :  { %10 = vsyncpa [#allocation4 + $0x1], 0 }
   0x4   :  { %11 = vsyncpa [#allocation7], 0 }
   0x5   :  { %12 = vsyncpa [#allocation5], 0 }
   0x6   :  { %14 = vsyncpa [#allocation5 + $0x1], 0  ;;  %s650_s12 = smov 0   ;;  %s652_s13 = smov 0  }
   0x7   :  { %s654_s14 = smov 0   ;;  %s656_s15 = smov 0  }
   0x8   :  { %s658_s16 = smov 0   ;;  %s660_s17 = smov 0  }
   0x9 LB: > { %s386_s18 = sadd.s32 4294967295, %s624_s17   ;;  %s387_s19 = sadd.s32 4294967294, %s624_s17   ;;  %s624_s17 = sphi %s660_s17, %s20_s17   ;;  %s620_s16 = sphi %s658_s16, %s829_s16   ;;  %s616_s15 = sphi %s656_s15, %s828_s15   ;;  %s612_s14 = sphi %s654_s14, %s827_s14   ;;  %s608_s13 = sphi %s652_s13, %s826_s13   ;;  %s604_s12 = sphi %s650_s12, %s825_s12  }
   0xa   : > { %s41_s20 = sadd.s32 1, %s612_s14  ;;  %p48_p0 = scmp.ne.s32.totalorder %s612_s14, %s608_s13 }
   0xb   : > { %p49_p1 = scmp.eq.s32.totalorder %s624_s17, 0  ;;  %p54_p2 = scmp.ne.s32.totalorder %s608_s13, %s604_s12 }
   0xc   : > { %p688_p3 = scmp.eq.s32.totalorder %s386_s18, 0  ;;  %p120_p4 = scmp.eq.s32.totalorder %s386_s18, 1 }
   0xd   : > { %p692_p5 = por %p49_p1, %p48_p0  ;;  %p126_p6 = scmp.eq.s32.totalorder %s387_s19, 1 }
   0xe   : > { %p698_p7 = por %p688_p3, %p54_p2  ;;  %p702_p8 = por %p120_p4, %p48_p0 }
   0xf   : > { %p706_p9 = por %p126_p6, %p54_p2  ;;  %p388_p10 = scmp.ge.s32.totalorder %s624_s17, 1 }
  0x10   : > { %p133_p11 = scmp.lt.s32.totalorder %s624_s17, 3  ;;  %s822_s1 = sld [smem:[#allocation12_spill]] }
  0x11   : > { %s626_s30 = smov [#allocation6]   ;;  %p390_p13 = scmp.ge.s32.totalorder %s624_s17, 2 }
  0x12   : > { %p715_p12 = pnand %p388_p10, %p133_p11  ;;  %s147_s4 = sshll.u32 %s626_s30, 4  ;;  %s148_s4 = int_to_ptr.vmem [resolvable:$true] %s147_s4 }
  0x13   : > { %p423_p1 = scmp.lt.s32.totalorder %s624_s17, 2  ;;  %s32_s6 = sadd.s32 1, %s620_s16 }
  0x14   : > { %p410_p0 = pneg %p715_p12  ;;  %p34_p6 = scmp.ge.s32.totalorder %s32_s6, 2 }
  0x15   : > { %p727_p4 = pnand %p423_p1, %p692_p5  ;;  %s161_s7 = sand.u32 1, %s612_s14  }
  0x16   : > { %s145_s28 = sshll.u32 %s822_s1, 4  ;;  %p411_p2 = pnand %p410_p0, %p688_p3  ;;  %s146_s28 = int_to_ptr.hbm [resolvable:$true] %s145_s28 }
  0x17   : > { %s831_s6 = smov (%p34_p6, %s32_s6), 0  ;;  %s391_s8 = sshll.u32 %s161_s7, 4 }
  0x18   : > { %413 = dma.hbm_to_vmem [thread:$0]  (!%p411_p2), %s146_s28, 64, %s148_s4, [#allocation7]  }
  0x19   : > { %s36_s9 = ssub.s32 %s620_s16, %s831_s6  ;;  %s401_s10 = sshll.u32 %s620_s16, 4 }
  0x1a   : > { %p39_p10 = scmp.eq.s32.totalorder %s36_s9, 0  ;;  %s172_s19 = scalar_lea.hbm %s812_s0, %s401_s10 }
  0x1b   : > { %s165_s22 = scalar_lea.vmem [#allocation3], %s391_s8  ;;  %s173_s30 = sshll.u32 %s172_s19, 4  ;;  %s174_s30 = int_to_ptr.hbm [resolvable:$true] %s173_s30 }
  0x1c   : > { %s175_s26 = sshll.u32 %s165_s22, 4  ;;  %s162_s28 = scalar_lea.sflag [#allocation4], %s161_s7  ;;  %s176_s26 = int_to_ptr.vmem [resolvable:$true] %s175_s26 }
  0x1d   : > { %s744_s27 = scalar_select %p39_p10, %s612_s14, %s41_s20  }
  0x1e   : > { %s627_s4 = smov 128   ;;  %s628_s1 = smov 8  }
  0x1f   : > { %417 = dma.hbm_to_vmem [thread:$0]  (!%p727_p4), %s174_s30, 256, %s176_s26, %s162_s28, %s627_s4, %s627_s4, %s628_s1  }
  0x20   : > { %187 = sbr.rel (%p715_p12) target bundleno = 204 (0xcc), region = 32  ;;  %s751_s9 = sand.u32 (!%p715_p12), 1, %s608_s13  }
  0x21   : > { %s395_s8 = sshll.u32 (!%p715_p12), %s751_s9, 4  ;;  %s190_s20 = scalar_lea.sflag (!%p715_p12), [#allocation4], %s751_s9 }
  0x22   : > { %s193_s10 = scalar_lea.vmem (!%p715_p12), [#allocation3], %s395_s8 }
  0x25   : > { %591 = dma.done.wait (%p698_p7), %s190_s20, 256  }
  0x26   : > { %593 = vsyncadd (%p698_p7), %s190_s20, 4294967040 }
  0x27   : > { %595 = dma.done.wait (%p688_p3), [#allocation7], 64  }
  0x28   : > { %597 = vsyncadd (%p688_p3), [#allocation7], 4294967232  ;;  %vm226_vm0 = vcmask 253952   ;;  %v629_v0 = vmov 0.0   ;;  %vm231_vm1 = vcmask 261120   ;;  %v229_v1 = vld [vmem:[%s193_s10] sm:$0xff]  ;;  %s295_s23 = scalar_lea.hbm %s815_s3, %s616_s15 }
  0x29   : > { %227 = vst.msk [vmem:[#allocation2] sm:$0x1] %vm226_vm0, %v629_v0  ;;  %v230_v2 = vld [vmem:[%s193_s10 + $0x8] sm:$0xff]  ;;  %v253_v3 = vld [vmem:[#allocation6] sm:$0xf]  ;;  %v232_v4 = vsel %vm231_vm1, %v229_v1, 0.0 }
  0x2a   : > { %v233_v5 = vsel %vm231_vm1, %v230_v2, 0.0  ;;  %397 = vmatpush.xpose.msk.msra.mxu0 %vm231_vm1, %v253_v3  ;;  %v282_v22 = vld [vmem:[%s814_s2] sm:$0x1]  ;;  %s220_s7 = scalar_lea.vmem [#allocation8], %s751_s9  ;;  %s299_s18 = sshll.u32 %s295_s23, 4  ;;  %vm284_vm2 = vcmask 24576   ;;  %s300_s18 = int_to_ptr.hbm [resolvable:$true] %s299_s18 }
  0x2b   : > { %v234_v6 = vadd.f32 %v233_v5, %v232_v4  ;;  %s297_s11 = sshll.u32 %s220_s7, 4  ;;  %s287_s19 = scalar_lea.sflag [#allocation5], %s751_s9  ;;  %s298_s11 = int_to_ptr.vmem [resolvable:$true] %s297_s11 }
  0x2c   : > { %s552_s22 = sshra.s32 %s300_s18, 4  ;;  %s558_s28 = scalar_lea.hbm %s815_s3, 2  ;;  %s553_s22 = int_to_ptr.hbm [resolvable:$true] %s552_s22 }
  0x2d   : > { %v235_v7 = vrot.slane %v234_v6, 4  ;;  %s554_s15 = scalar_lea.hbm %s553_s22, 1  ;;  %p559_p11 = scmp.lt.s32.totalorder %s553_s22, %s815_s3 }
  0x2e   : > { %p555_p3 = scmp.ne.s32.totalorder %s553_s22, %s554_s15  ;;  %p560_p12 = scmp.lt.s32.totalorder %s558_s28, %s554_s15 }
  0x2f   : > { %v236_v8 = vadd.f32 %v235_v7, %v234_v6 }
  0x30   : > { %v228_v12 = vld [vmem:[#allocation2] sm:$0x1]  ;;  %p556_p5 = pnand %p555_p3, %p702_p8  ;;  %p561_p0 = por %p560_p12, %p559_p11 }
  0x31   : > { %v237_v9 = vrot.slane %v236_v8, 2 }
  0x32   : > { %p557_p7 = pneg %p556_p5 }
  0x33   : > { %v238_v10 = vadd.f32 %v237_v9, %v236_v8 }
  0x34   : > { %p562_p1 = pnand %p561_p0, %p557_p7 }
  0x35   : > { %v239_v11 = vrot.slane %v238_v10, 1 }
  0x37   : > { %v240_v13 = vadd.f32 %v239_v11, %v238_v10 }
  0x39   : > { %v241_v14 = vadd.f32 %v240_v13, %v228_v12 }
  0x3b   : > { %243 = vst.msk [vmem:[#allocation2] sm:$0x1] %vm226_vm0, %v241_v14 }
  0x42   : > { %v247_v15 = vld [vmem:[#allocation2] sm:$0x1] }
  0x43   : > { %v248_v16 = vmul.f32 0.0625, %v247_v15 }
  0x45   : > { %398 = vmatmul.msk.f32.vlgmr.msra.gmra.mxu0 %vm231_vm1, %v248_v16  ;;  %v249_v17 = vmul.f32 %v248_v16, %v248_v16 }
  0x47   : > { %v250_v18 = vsel %vm226_vm0, %v249_v17, 0.0 }
  0x48   : > { %251 = vadd.xlane.f32.xlu0 %v250_v18 }
  0xbb   : > { %v252_v20 = vpop.xlane.xlu0 %251 }
  0xc2   : > { %v277_v19 = vpop.f32.mrf.mxu0 }
  0xc3   : > { %v280_v21 = vmul.f32 2.0, %v277_v19 }
  0xc5   : > { %v281_v23 = vsub.f32 %v280_v21, %v252_v20 }
  0xc7   : > { %v283_v24 = vsub.f32 %v281_v23, %v282_v22 }
  0xc9   : > { %285 = vst.msk [vmem:[%s220_s7] sm:$0x1] %vm284_vm2, %v283_v24 }
  0xca   : > { %565 = shalt.err (!%p562_p1)
}
  0xcb   : > { %408 = dma.vmem_to_hbm [thread:$0]  (%p702_p8), %s298_s11, 16, %s300_s18, %s287_s19  }
  0xcc PF: > { %s311_s9 = sand.u32 1, %s604_s12   ;;  %p419_p2 = pnand %p390_p13, %p706_p9 }
  0xcd   : > { %s312_s20 = scalar_lea.sflag [#allocation5], %s311_s9 }
  0xce   : > { %p420_p4 = pneg %p419_p2 }
  0xd0   : > { %599 = dma.done.wait (%p420_p4), %s312_s20, 16  }
  0xd1   : > { %601 = vsyncadd (%p420_p4), %s312_s20, 4294967280  ;;  %s20_s17 = sadd.s32 1, %s624_s17   ;;  %s825_s12 = smov %s608_s13 }
  0xd2   : > { %p17_p6 = scmp.ge.s32.totalorder %s20_s17, 4   ;;  %s826_s13 = smov %s612_s14 }
  0xd3   : > { %s827_s14 = smov %s744_s27  ;;  %s828_s15 = smov %s620_s16 }
  0xd4   : > { %s829_s16 = smov %s831_s6  ;;  %19 = sbr.rel (!%p17_p6) target bundleno = 9 (0x9), region = 89 }
  0xd9   :  { %317 = vsyncpa [#allocation4], 1 }
  0xda   :  { %319 = vsyncpa [#allocation4 + $0x1], 1 }
  0xdb   :  { %320 = vsyncpa [#allocation7], 1 }
  0xdc   :  { %321 = vsyncpa [#allocation5], 1 }
  0xdd   :  { %323 = vsyncpa [#allocation5 + $0x1], 1 }

</bundles_post_ra>
